<compile_context>
chip_gen: v6e
topology: v6e:2x2x1
jax: 0.10.0
libtpu: 0.0.40
codegen_flags: <defaults>
</compile_context>

<pallas_src>
import functools

import jax
import jax.numpy as jnp
from jax.experimental import pallas as pl
from jax.experimental.pallas import tpu as pltpu

C = 16          # fixed by Conv2d(16, 16, 7) weights
KSIZE = 7
CENTER = KSIZE // 2


def _model_kernel(x1_ref, x2_ref, x3_ref, wcat_ref, w3t_ref, bcat_ref, b3_ref,
                  out_ref, *, hw):
    # x*_ref : (b_tile, C, HW) f32 -- full (C, HW) extent, batch-blocked.
    # wcat   : (C, 2C)  = [W1^T | W1^T @ W2^T]
    # bcat   : (1, 2C)  = [b1   | b1 @ W2^T + b2]
    # w3t    : (C, C)   = W3^T ;  b3 : (1, C)
    x1 = x1_ref[...]

    # v0 = x1.mean((2,3)) -- full-extent HW block => exact mean, no masking
    v0 = jnp.sum(x1, axis=-1) * jnp.float32(1.0 / hw)               # (bt, C)

    # conv1/conv2 on a 1x1 keepdim map == center-tap matmuls + bias; both
    # fused into a single (bt,C)@(C,2C) MXU dot to shorten the dep chain.
    vc = jnp.dot(v0, wcat_ref[...],
                 preferred_element_type=jnp.float32) + bcat_ref[...]
    v2 = vc[:, :C]                       # == v1 == amin over a 1x1 map
    v3 = vc[:, C:]

    v4 = v3[:, :, None] * x2_ref[...]
    v5 = jnp.maximum(v4, 0.0)            # relu
    v6 = v2[:, :, None] + v5
    v7 = jnp.maximum(v6, 0.0)            # relu
    v8 = jnp.min(v7, axis=-1)            # amin over spatial -> (bt, C)

    v9 = jnp.dot(v8, w3t_ref[...],
                 preferred_element_type=jnp.float32) + b3_ref[...]
    v10 = v9[:, :, None] + x3_ref[...]
    out_ref[...] = jnp.minimum(v10, 0.0)   # == v10 - relu(v10)


def _num_tensorcores():
    """Best-effort TensorCore count of the local device (megacore detection)."""
    try:
        kind = jax.devices()[0].device_kind.lower()
        if any(t in kind for t in ("v7", "tpu7", "v4", "v5p")):
            return 2
    except Exception:
        pass
    return 1


def model_forward(x1, x2, x3, params, *, b_tile=None):
    """x1,x2,x3: (N, C, H, W) float32 (NCHW, matching the PyTorch module)."""
    w1c, b1, w2c, b2, w3c, b3 = params
    N, c, H, W = x1.shape
    assert c == C
    HW = H * W

    # ---- host-side param packing (tiny, one-time) ----
    w1t = w1c.T                                             # (C, C)
    w2t = w2c.T
    wcat = jnp.concatenate([w1t, w1t @ w2t], axis=1)        # (C, 2C)
    bcat = jnp.concatenate([b1, b1 @ w2t + b2])[None, :]    # (1, 2C)
    w3t = w3c.T                                             # (C, C)
    b3r = b3[None, :]                                       # (1, C)

    # ---- batch tile heuristic (the only blocked axis) ----
    row_bytes = C * HW * 4
    if b_tile is None:
        target = 2 << 20                      # ~2 MiB per input block
        b_tile = max(1, target // row_bytes)
        b_tile = min(b_tile, N)
        if _num_tensorcores() >= 2 and N >= 2:
            # megacore: aim for >=2 grid steps per TensorCore, even step count
            b_tile = min(b_tile, max(1, pl.cdiv(N, 4)))
            steps = pl.cdiv(N, b_tile)
            if steps > 1 and steps % 2 == 1:
                bt2 = pl.cdiv(N, steps + 1)
                if pl.cdiv(N, bt2) % 2 == 0:
                    b_tile = bt2
    b_tile = max(1, min(int(b_tile), N))

    block_bytes = b_tile * row_bytes
    # 4 streams x 2 buffers + elementwise temps; cap under v7x's 64 MiB VMEM.
    vmem_limit = int(min(48 << 20, max(32 << 20, 14 * block_bytes)))

    # free (contiguous) reshapes only -- no padding, no extra HBM copies
    x1f = x1.reshape(N, C, HW)
    x2f = x2.reshape(N, C, HW)
    x3f = x3.reshape(N, C, HW)

    img_spec = pl.BlockSpec((b_tile, C, HW), lambda i: (i, 0, 0))
    kernel = functools.partial(_model_kernel, hw=HW)

    out = pl.pallas_call(
        kernel,
        out_shape=jax.ShapeDtypeStruct((N, C, HW), jnp.float32),
        grid=(pl.cdiv(N, b_tile),),
        in_specs=[img_spec, img_spec, img_spec,
                  pl.BlockSpec((C, 2 * C), lambda i: (0, 0)),
                  pl.BlockSpec((C, C), lambda i: (0, 0)),
                  pl.BlockSpec((1, 2 * C), lambda i: (0, 0)),
                  pl.BlockSpec((1, C), lambda i: (0, 0))],
        out_specs=img_spec,
        compiler_params=pltpu.CompilerParams(
            dimension_semantics=("parallel",),
            vmem_limit_bytes=vmem_limit),
    )(x1f, x2f, x3f, wcat, w3t, bcat, b3r)

    return out.reshape(N, C, H, W)


def init_conv_params(key):
    """Deterministic Conv2d(16,16,7) init (PyTorch-style uniform bounds).
    Returns only the center-tap (C,C) weights + (C,) biases for each conv."""
    fan_in = C * KSIZE * KSIZE
    bound = 1.0 / jnp.sqrt(fan_in)
    keys = jax.random.split(key, 6)
    params = []
    for i in range(3):
        w_full = jax.random.uniform(keys[2 * i], (C, C, KSIZE, KSIZE),
                                    jnp.float32, -bound, bound)
        b = jax.random.uniform(keys[2 * i + 1], (C,), jnp.float32, -bound, bound)
        params.append(w_full[:, :, CENTER, CENTER])   # only the center tap matters
        params.append(b)
    return tuple(params)


def ref_forward(x1, x2, x3, params):
    """Pure-JAX reference of the repaired forward (for verification)."""
    w1c, b1, w2c, b2, w3c, b3 = params
    v0 = x1.mean(axis=(2, 3))                  # (N, C)
    v1 = v0 @ w1c.T + b1
    v2 = v1
    v3 = v2 @ w2c.T + b2
    v4 = v3[:, :, None, None] * x2
    v5 = jnp.maximum(v4, 0.0)
    v6 = v2[:, :, None, None] + v5
    v7 = jnp.maximum(v6, 0.0)
    v8 = v7.min(axis=(2, 3))
    v9 = v8 @ w3c.T + b3
    v10 = v9[:, :, None, None] + x3
    v11 = jnp.maximum(v10, 0.0)
    return v10 - v11


if __name__ == "__main__":
    key = jax.random.PRNGKey(0)
    kp, kdata = jax.random.split(key)
    params = init_conv_params(kp)

    # (N, H, W, forced b_tile): 128-aligned HW / unaligned HW (no padding
    # needed now) / forced partial batch edge block.
    cases = [(2, 16, 16, None), (3, 14, 14, None), (8, 16, 16, 3)]
    for N, H, W, bt in cases:
        kx1, kx2, kx3, kdata = jax.random.split(kdata, 4)
        x1 = jax.random.normal(kx1, (N, C, H, W), jnp.float32)
        x2 = jax.random.normal(kx2, (N, C, H, W), jnp.float32)
        x3 = jax.random.normal(kx3, (N, C, H, W), jnp.float32)

        out = jax.block_until_ready(model_forward(x1, x2, x3, params, b_tile=bt))
        ref = ref_forward(x1, x2, x3, params)

        assert out.shape == (N, C, H, W)
        assert jnp.allclose(out, ref, atol=1e-5, rtol=1e-5), \
            f"mismatch vs reference for case {(N, H, W, bt)}"

    print("KERNEL_OK")
</pallas_src>

<mosaic_0001>
module attributes {stable_mosaic.version = 11 : i64} {
  func.func @_model_kernel(%arg0: i32, %arg1: memref<2x16x256xf32, #tpu.memory_space<vmem>>, %arg2: memref<2x16x256xf32, #tpu.memory_space<vmem>>, %arg3: memref<2x16x256xf32, #tpu.memory_space<vmem>>, %arg4: memref<16x32xf32, #tpu.memory_space<vmem>>, %arg5: memref<16x16xf32, #tpu.memory_space<vmem>>, %arg6: memref<1x32xf32, #tpu.memory_space<vmem>>, %arg7: memref<1x16xf32, #tpu.memory_space<vmem>>, %arg8: memref<2x16x256xf32, #tpu.memory_space<vmem>>) attributes {dimension_semantics = [#tpu.dimension_semantics<parallel>], iteration_bounds = array<i64: 1>, scalar_prefetch = 0 : i64, scratch_operands = 0 : i64, tpu.core_type = #tpu.core_type<tc>, window_params = [{transform_indices = @transform_0, window_bounds = array<i64: 2, 16, 256>}, {transform_indices = @transform_1, window_bounds = array<i64: 2, 16, 256>}, {transform_indices = @transform_2, window_bounds = array<i64: 2, 16, 256>}, {pipeline_mode = #tpu.pipeline_mode<synchronous>, transform_indices = @transform_3, window_bounds = array<i64: 16, 32>}, {pipeline_mode = #tpu.pipeline_mode<synchronous>, transform_indices = @transform_4, window_bounds = array<i64: 16, 16>}, {pipeline_mode = #tpu.pipeline_mode<synchronous>, transform_indices = @transform_5, window_bounds = array<i64: 1, 32>}, {pipeline_mode = #tpu.pipeline_mode<synchronous>, transform_indices = @transform_6, window_bounds = array<i64: 1, 16>}, {transform_indices = @transform_7, window_bounds = array<i64: 2, 16, 256>}]} {
    %c0 = arith.constant 0 : index
    %c0_0 = arith.constant 0 : index
    %c0_1 = arith.constant 0 : index
    %0 = vector.load %arg1[%c0, %c0_0, %c0_1] : memref<2x16x256xf32, #tpu.memory_space<vmem>>, vector<2x16x256xf32>
    %cst = arith.constant dense<0.000000e+00> : vector<2x16xf32>
    %1 = vector.multi_reduction <add>, %0, %cst [2] : vector<2x16x256xf32> to vector<2x16xf32>
    %cst_2 = arith.constant 3.906250e-03 : f32
    %2 = vector.broadcast %cst_2 : f32 to vector<2x16xf32>
    %3 = arith.mulf %1, %2 : vector<2x16xf32>
    %c0_3 = arith.constant 0 : index
    %c0_4 = arith.constant 0 : index
    %4 = vector.load %arg4[%c0_3, %c0_4] : memref<16x32xf32, #tpu.memory_space<vmem>>, vector<16x32xf32>
    %cst_5 = arith.constant dense<0.000000e+00> : vector<2x32xf32>
    %5 = tpu.matmul %3, %4, %cst_5 {dimension_numbers = #tpu.dot_dimension_numbers<[1], [0], [0], [1], [0, 0, 1, 1], [], []>} : vector<2x16xf32>, vector<16x32xf32>, vector<2x32xf32> -> vector<2x32xf32>
    %c0_6 = arith.constant 0 : index
    %c0_7 = arith.constant 0 : index
    %6 = vector.load %arg6[%c0_6, %c0_7] : memref<1x32xf32, #tpu.memory_space<vmem>>, vector<1x32xf32>
    %7 = vector.broadcast %6 : vector<1x32xf32> to vector<2x32xf32>
    %8 = arith.addf %5, %7 : vector<2x32xf32>
    %9 = vector.extract_strided_slice %8 {offsets = [0, 0], sizes = [2, 16], strides = [1, 1]} : vector<2x32xf32> to vector<2x16xf32>
    %10 = vector.extract_strided_slice %8 {offsets = [0, 16], sizes = [2, 16], strides = [1, 1]} : vector<2x32xf32> to vector<2x16xf32>
    %11 = vector.shape_cast %10 : vector<2x16xf32> to vector<2x16x1xf32>
    %c0_8 = arith.constant 0 : index
    %c0_9 = arith.constant 0 : index
    %c0_10 = arith.constant 0 : index
    %12 = vector.load %arg2[%c0_8, %c0_9, %c0_10] : memref<2x16x256xf32, #tpu.memory_space<vmem>>, vector<2x16x256xf32>
    %13 = vector.broadcast %11 : vector<2x16x1xf32> to vector<2x16x256xf32>
    %14 = arith.mulf %13, %12 : vector<2x16x256xf32>
    %cst_11 = arith.constant 0.000000e+00 : f32
    %15 = vector.broadcast %cst_11 : f32 to vector<2x16x256xf32>
    %16 = arith.maximumf %14, %15 : vector<2x16x256xf32>
    %17 = vector.shape_cast %9 : vector<2x16xf32> to vector<2x16x1xf32>
    %18 = vector.broadcast %17 : vector<2x16x1xf32> to vector<2x16x256xf32>
    %19 = arith.addf %18, %16 : vector<2x16x256xf32>
    %cst_12 = arith.constant 0.000000e+00 : f32
    %20 = vector.broadcast %cst_12 : f32 to vector<2x16x256xf32>
    %21 = arith.maximumf %19, %20 : vector<2x16x256xf32>
    %cst_13 = arith.constant dense<0x7F800000> : vector<2x16xf32>
    %22 = vector.multi_reduction <minimumf>, %21, %cst_13 [2] : vector<2x16x256xf32> to vector<2x16xf32>
    %c0_14 = arith.constant 0 : index
    %c0_15 = arith.constant 0 : index
    %23 = vector.load %arg5[%c0_14, %c0_15] : memref<16x16xf32, #tpu.memory_space<vmem>>, vector<16x16xf32>
    %cst_16 = arith.constant dense<0.000000e+00> : vector<2x16xf32>
    %24 = tpu.matmul %22, %23, %cst_16 {dimension_numbers = #tpu.dot_dimension_numbers<[1], [0], [0], [1], [0, 0, 1, 1], [], []>} : vector<2x16xf32>, vector<16x16xf32>, vector<2x16xf32> -> vector<2x16xf32>
    %c0_17 = arith.constant 0 : index
    %c0_18 = arith.constant 0 : index
    %25 = vector.load %arg7[%c0_17, %c0_18] : memref<1x16xf32, #tpu.memory_space<vmem>>, vector<1x16xf32>
    %26 = vector.broadcast %25 : vector<1x16xf32> to vector<2x16xf32>
    %27 = arith.addf %24, %26 : vector<2x16xf32>
    %28 = vector.shape_cast %27 : vector<2x16xf32> to vector<2x16x1xf32>
    %c0_19 = arith.constant 0 : index
    %c0_20 = arith.constant 0 : index
    %c0_21 = arith.constant 0 : index
    %29 = vector.load %arg3[%c0_19, %c0_20, %c0_21] : memref<2x16x256xf32, #tpu.memory_space<vmem>>, vector<2x16x256xf32>
    %30 = vector.broadcast %28 : vector<2x16x1xf32> to vector<2x16x256xf32>
    %31 = arith.addf %30, %29 : vector<2x16x256xf32>
    %cst_22 = arith.constant 0.000000e+00 : f32
    %32 = vector.broadcast %cst_22 : f32 to vector<2x16x256xf32>
    %33 = arith.minimumf %31, %32 : vector<2x16x256xf32>
    %c0_23 = arith.constant 0 : index
    %c0_24 = arith.constant 0 : index
    %c0_25 = arith.constant 0 : index
    %34 = vector.load %arg8[%c0_23, %c0_24, %c0_25] : memref<2x16x256xf32, #tpu.memory_space<vmem>>, vector<2x16x256xf32>
    tpu.vector_store %arg8[%c0_23, %c0_24, %c0_25], %33 {strides = array<i32>} : memref<2x16x256xf32, #tpu.memory_space<vmem>>, vector<2x16x256xf32>,
    return
  }
  func.func @transform_0(%arg0: i32) -> (i32, i32, i32) {
    %c0_i32 = arith.constant 0 : i32
    %c0_i32_0 = arith.constant 0 : i32
    %c0_i32_1 = arith.constant 0 : i32
    return %arg0, %c0_i32, %c0_i32_0 : i32, i32, i32
  }
  func.func @transform_1(%arg0: i32) -> (i32, i32, i32) {
    %c0_i32 = arith.constant 0 : i32
    %c0_i32_0 = arith.constant 0 : i32
    %c0_i32_1 = arith.constant 0 : i32
    return %arg0, %c0_i32, %c0_i32_0 : i32, i32, i32
  }
  func.func @transform_2(%arg0: i32) -> (i32, i32, i32) {
    %c0_i32 = arith.constant 0 : i32
    %c0_i32_0 = arith.constant 0 : i32
    %c0_i32_1 = arith.constant 0 : i32
    return %arg0, %c0_i32, %c0_i32_0 : i32, i32, i32
  }
  func.func @transform_3(%arg0: i32) -> (i32, i32) {
    %c0_i32 = arith.constant 0 : i32
    %c0_i32_0 = arith.constant 0 : i32
    %c0_i32_1 = arith.constant 0 : i32
    return %c0_i32, %c0_i32_0 : i32, i32
  }
  func.func @transform_4(%arg0: i32) -> (i32, i32) {
    %c0_i32 = arith.constant 0 : i32
    %c0_i32_0 = arith.constant 0 : i32
    %c0_i32_1 = arith.constant 0 : i32
    return %c0_i32, %c0_i32_0 : i32, i32
  }
  func.func @transform_5(%arg0: i32) -> (i32, i32) {
    %c0_i32 = arith.constant 0 : i32
    %c0_i32_0 = arith.constant 0 : i32
    %c0_i32_1 = arith.constant 0 : i32
    return %c0_i32, %c0_i32_0 : i32, i32
  }
  func.func @transform_6(%arg0: i32) -> (i32, i32) {
    %c0_i32 = arith.constant 0 : i32
    %c0_i32_0 = arith.constant 0 : i32
    %c0_i32_1 = arith.constant 0 : i32
    return %c0_i32, %c0_i32_0 : i32, i32
  }
  func.func @transform_7(%arg0: i32) -> (i32, i32, i32) {
    %c0_i32 = arith.constant 0 : i32
    %c0_i32_0 = arith.constant 0 : i32
    %c0_i32_1 = arith.constant 0 : i32
    return %arg0, %c0_i32, %c0_i32_0 : i32, i32, i32
  }
}

</mosaic_0001>

<bundles_post_ra>
// kernel: tpu_custom_call.1
= control target key start
LH: loop header
LB: loop body
LE: loop exit
PB: predicated region body
PF: predicated region fallthrough
CT: control target
= control target key end

     0   :  { %12 = vsyncpa [#allocation3], 0  ;;  %s794_s0 = inlined_call_operand.hbm [shape: f32[2,16,256], index: 0, kind: input, shape index: {}]   ;;  %s795_s1 = inlined_call_operand.hbm [shape: f32[2,16,256], index: 1, kind: input, shape index: {}]   ;;  %s796_s2 = inlined_call_operand.hbm [shape: f32[2,16,256], index: 2, kind: input, shape index: {}]   ;;  %s797_s3 = inlined_call_operand.hbm [shape: f32[16,32], index: 3, kind: input, shape index: {}]   ;;  %s798_s4 = inlined_call_operand.hbm [shape: f32[16,16], index: 4, kind: input, shape index: {}]   ;;  %s799_s5 = inlined_call_operand.vmem [shape: f32[1,32], index: 5, kind: input, shape index: {}]   ;;  %s800_s6 = inlined_call_operand.vmem [shape: f32[1,16], index: 6, kind: input, shape index: {}]   ;;  %s801_s7 = inlined_call_operand.hbm [shape: f32[2,16,256], index: 7, kind: output, shape index: {}]  }
   0x1   :  { %13 = vsyncpa [#allocation6], 0 }
   0x2   :  { %14 = vsyncpa [#allocation9], 0 }
   0x3   :  { %15 = vsyncpa [#allocation4], 0  ;;  %s660_s24 = smov [#allocation5]   ;;  %s661_s26 = smov [#allocation8]  }
   0x4   :  { %s33_s25 = sshll.u32 %s660_s24, 4  ;;  %s57_s27 = sshll.u32 %s661_s26, 4  ;;  %s34_s25 = int_to_ptr.vmem [resolvable:$true] %s33_s25  ;;  %s58_s27 = int_to_ptr.vmem [resolvable:$true] %s57_s27 }
   0x5   :  { %s540_s28 = scalar_lea.vmem %s34_s25, 1024  ;;  %p545_p1 = scmp.lt.s32.totalorder %s34_s25, %s34_s25 }
   0x6   :  { %p541_p0 = scmp.ne.s32.totalorder %s34_s25, %s540_s28  ;;  %p546_p2 = scmp.lt.s32.totalorder %s540_s28, %s540_s28 }
   0x8   :  { %p547_p3 = por %p546_p2, %p545_p1 }
   0xa   :  { %p548_p4 = pnand %p547_p3, %p541_p0 }
   0xc   :  { %551 = shalt.err (!%p548_p4)
}
   0xd   :  { %s662_s29 = smov 256   ;;  %s663_s30 = smov 16  }
   0xe   :  { %39 = dma.hbm_to_vmem [thread:$0]  %s795_s1, 1024, %s34_s25, [#allocation6], %s662_s29, %s662_s29, %s663_s30  }
   0xf   :  { %s560_s10 = scalar_lea.vmem %s58_s27, 256  ;;  %p565_p6 = scmp.lt.s32.totalorder %s58_s27, %s58_s27 }
  0x10   :  { %p561_p5 = scmp.ne.s32.totalorder %s58_s27, %s560_s10  ;;  %p566_p7 = scmp.lt.s32.totalorder %s560_s10, %s560_s10 }
  0x12   :  { %p567_p8 = por %p566_p7, %p565_p6 }
  0x14   :  { %p568_p9 = pnand %p567_p8, %p561_p5 }
  0x16   :  { %571 = shalt.err (!%p568_p9)
}
  0x17   :  { %s664_s11 = smov 128   ;;  %s665_s12 = smov 8  }
  0x18   :  { %63 = dma.hbm_to_vmem [thread:$0]  %s797_s3, 256, %s58_s27, [#allocation9], %s664_s11, %s664_s11, %s665_s12  }
  0x19   :  { %s666_s15 = smov [#allocation2]   ;;  %s667_s17 = smov [#allocation7]  }
  0x1a   :  { %s21_s16 = sshll.u32 %s666_s15, 4  ;;  %s45_s1 = sshll.u32 %s667_s17, 4  ;;  %s22_s16 = int_to_ptr.vmem [resolvable:$true] %s21_s16  ;;  %s46_s1 = int_to_ptr.vmem [resolvable:$true] %s45_s1 }
  0x1b   :  { %s580_s18 = scalar_lea.vmem %s22_s16, 1024  ;;  %p585_p11 = scmp.lt.s32.totalorder %s22_s16, %s22_s16 }
  0x1c   :  { %p581_p10 = scmp.ne.s32.totalorder %s22_s16, %s580_s18  ;;  %p586_p12 = scmp.lt.s32.totalorder %s580_s18, %s580_s18 }
  0x1e   :  { %p587_p13 = por %p586_p12, %p585_p11 }
  0x20   :  { %p588_p0 = pnand %p587_p13, %p581_p10 }
  0x22   :  { %591 = shalt.err (!%p588_p0)
}
  0x23   :  { %27 = dma.hbm_to_vmem [thread:$0]  %s794_s0, 1024, %s22_s16, [#allocation3], %s662_s29, %s662_s29, %s663_s30  }
  0x24   :  { %s600_s3 = scalar_lea.vmem %s46_s1, 1024  ;;  %p605_p2 = scmp.lt.s32.totalorder %s46_s1, %s46_s1 }
  0x25   :  { %p601_p1 = scmp.ne.s32.totalorder %s46_s1, %s600_s3  ;;  %p606_p3 = scmp.lt.s32.totalorder %s600_s3, %s600_s3 }
  0x27   :  { %p607_p4 = por %p606_p3, %p605_p2 }
  0x29   :  { %p608_p5 = pnand %p607_p4, %p601_p1 }
  0x2b   :  { %611 = shalt.err (!%p608_p5)
}
  0x2c   :  { %51 = dma.hbm_to_vmem [thread:$0]  %s796_s2, 1024, %s46_s1, [#allocation6], %s662_s29, %s662_s29, %s663_s30  }
  0x2d   :  { %s668_s23 = smov [#allocation10]  }
  0x2e   :  { %s69_s24 = sshll.u32 %s668_s23, 4  ;;  %s70_s24 = int_to_ptr.vmem [resolvable:$true] %s69_s24 }
  0x2f   :  { %s620_s25 = scalar_lea.vmem %s70_s24, 256  ;;  %p625_p7 = scmp.lt.s32.totalorder %s70_s24, %s70_s24 }
  0x30   :  { %p621_p6 = scmp.ne.s32.totalorder %s70_s24, %s620_s25  ;;  %p626_p8 = scmp.lt.s32.totalorder %s620_s25, %s620_s25 }
  0x32   :  { %p627_p9 = por %p626_p8, %p625_p7 }
  0x34   :  { %p628_p10 = pnand %p627_p9, %p621_p6 }
  0x36   :  { %631 = shalt.err (!%p628_p10)
}
  0x37   :  { %75 = dma.hbm_to_vmem [thread:$0]  %s798_s4, 256, %s70_s24, [#allocation9], %s664_s11, %s664_s11, %s665_s12  }
  0x38   :  { %652 = dma.done.wait [#allocation3], 1024  }
  0x39   :  { %653 = vsyncadd [#allocation3], 4294966272 }
  0x3a   :  { %654 = dma.done.wait [#allocation6], 2048  }
  0x3b   :  { %655 = vsyncadd [#allocation6], 4294965248 }
  0x3c   :  { %656 = dma.done.wait [#allocation9], 512  }
  0x3d   :  { %657 = vsyncadd [#allocation9], 4294966784  ;;  %v99_v0 = vld [vmem:[#allocation2 + $0x20] sm:$0xff]  ;;  %v100_v1 = vld [vmem:[#allocation2 + $0x28] sm:$0xff]  ;;  %v669_v12 = vmov 0.0   ;;  %vm670_vm0 = vmmov 0   ;;  %v132_v15 = vlaneseq }
  0x3e   :  { %v95_v2 = vld [vmem:[#allocation2] sm:$0xff]  ;;  %v109_v3 = vadd.f32 %v100_v1, %v99_v0  ;;  %v96_v4 = vld [vmem:[#allocation2 + $0x8] sm:$0xff]  ;;  %v101_v5 = vld [vmem:[#allocation2 + $0x30] sm:$0xff]  ;;  %506 = vmatprep.subr.mxu0 %v669_v12  ;;  %513 = vmatprep.subr.mxu1 %v669_v12  ;;  %vm143_vm1 = vcmask 130112   ;;  %vm154_vm2 = vcmask 1041409   ;;  %vm156_vm3 = vcmask 130048  }
  0x3f   :  { %v102_v6 = vld [vmem:[#allocation2 + $0x38] sm:$0xff]  ;;  %v103_v7 = vadd.f32 %v96_v4, %v95_v2  ;;  %v97_v8 = vld [vmem:[#allocation2 + $0x10] sm:$0xff]  ;;  %v120_v13 = vld [vmem:[#allocation8 + $0x8] sm:$0xff]  ;;  %510 = vmatprep.mubr.msk.f32.mxu0 %vm670_vm0, %v669_v12  ;;  %517 = vmatprep.mubr.msk.f32.mxu1 %vm670_vm0, %v669_v12  ;;  %v133_v16 = vand.u32 127, %v132_v15  ;;  %v747_v17 = vshrl.u32 %v132_v15, 7 }
  0x40   :  { %v98_v9 = vld [vmem:[#allocation2 + $0x18] sm:$0xff]  ;;  %110 = vadd.xlane.f32.xlu1 %v109_v3  ;;  %v112_v10 = vadd.f32 %v102_v6, %v101_v5  ;;  %v119_v14 = vld [vmem:[#allocation8] sm:$0xff]  ;;  %507 = vmatpush3.msra.mxu0 %v120_v13  ;;  %v254_v45 = vld [vmem:[#allocation5 + $0x8] sm:$0xff] }
  0x41   :  { %104 = vadd.xlane.f32.xlu0 %v103_v7  ;;  %v106_v11 = vadd.f32 %v98_v9, %v97_v8  ;;  %508 = vmatprep.subr.mxu0 %v669_v12  ;;  %v138_v18 = vadd.s32 4294967288, %v133_v16  ;;  %v750_v21 = vsub.s32 %v133_v16, %v747_v17  ;;  %v496_v36 = vld [vmem:[%s799_s5] ss:$0 sm:$0xff]  ;;  %v231_v37 = vsub.s32 0, %v747_v17  ;;  %v258_v51 = vld [vmem:[#allocation5 + $0x28] sm:$0xff]  ;;  %v255_v52 = vld [vmem:[#allocation5 + $0x10] sm:$0xff] }
  0x42   :  { %509 = vmatpush3.msra.mxu0 %v119_v14  ;;  %v243_v42 = vsub.s32 1, %v747_v17  ;;  %v253_v44 = vld [vmem:[#allocation5] sm:$0xff]  ;;  %v256_v53 = vld [vmem:[#allocation5 + $0x18] sm:$0xff]  ;;  %v259_v4 = vld [vmem:[#allocation5 + $0x30] sm:$0xff] }
  0x43   :  { %v753_v23 = vsub.s32 %v138_v18, %v747_v17  ;;  %v257_v50 = vld [vmem:[#allocation5 + $0x20] sm:$0xff]  ;;  %v260_v5 = vld [vmem:[#allocation5 + $0x38] sm:$0xff] }
  0x44   :  { %113 = vadd.xlane.f32.xlu1 %v112_v10 }
  0x45   :  { %107 = vadd.xlane.f32.xlu0 %v106_v11 }
  0xc9   :  { %v111_v19 = vpop.xlane.xlu1 %110 }
  0xca   :  { %v105_v20 = vpop.xlane.xlu0 %104  ;;  %v117_v22 = vmul.f32 0.00390625, %v111_v19 }
  0xcb   :  { %v115_v24 = vmul.f32 0.00390625, %v105_v20 }
  0xcc   :  { %v148_v29 = vrot.slane %v117_v22, %v750_v21 }
  0xcd   :  { %v114_v25 = vpop.xlane.xlu1 %113  ;;  %v137_v31 = vrot.slane %v115_v24, %v750_v21 }
  0xce   :  { %v118_v26 = vmul.f32 0.00390625, %v114_v25  ;;  %v108_v27 = vpop.xlane.xlu0 %107 }
  0xcf   :  { %v116_v28 = vmul.f32 0.00390625, %v108_v27 }
  0xd0   :  { %v152_v30 = vrot.slane %v118_v26, %v753_v23 }
  0xd1   :  { %v142_v32 = vrot.slane %v116_v28, %v753_v23 }
  0xd2   :  { %v153_v33 = vsel %vm143_vm1, %v152_v30, %v148_v29 }
  0xd3   :  { %v144_v34 = vsel %vm143_vm1, %v142_v32, %v137_v31 }
  0xd4   :  { %v155_v35 = vsel %vm154_vm2, %v153_v33, %v144_v34 }
  0xd5   :  { %511 = vmatmul.mubr.msk.f32.vlgmr.msra.gmra.mxu0 %vm156_vm3, %v155_v35 }
 0x195   :  { %v225_v38 = vpop.f32.mrf.mxu0 }
 0x196   :  { %v226_v39 = vadd.f32 %v496_v36, %v225_v38  ;;  %v320_v36 = vld [vmem:[#allocation10 + $0x8] sm:$0xff]  ;;  %v319_v38 = vld [vmem:[#allocation10] sm:$0xff] }
 0x197   :  { %v512_v40 = vpop.f32.mrf.mxu0  ;;  %514 = vmatpush3.msra.mxu1 %v320_v36 }
 0x198   :  { %v232_v41 = vrot.slane %v226_v39, %v231_v37  ;;  %v244_v43 = vrot.slane %v226_v39, %v243_v42  ;;  %515 = vmatprep.subr.mxu1 %v669_v12  ;;  %v498_v12 = vld [vmem:[%s800_s6] ss:$0 sm:$0xff]  ;;  %s671_s6 = smov [#allocation11]  }
 0x199   :  { %516 = vmatpush3.msra.mxu1 %v319_v38  ;;  %s482_s28 = sshll.u32 %s671_s6, 4  ;;  %s483_s28 = int_to_ptr.vmem [resolvable:$true] %s482_s28 }
 0x19a   :  { %239 = vbcast.lane.b32.xlu1 %v232_v41, 280  ;;  %235 = vbcast.lane.b32.xlu0 %v232_v41, 272  ;;  %s632_s8 = scalar_lea.vmem %s483_s28, 1024  ;;  %p637_p12 = scmp.lt.s32.totalorder %s483_s28, %s483_s28 }
 0x19b   :  { %p633_p11 = scmp.ne.s32.totalorder %s483_s28, %s632_s8  ;;  %p638_p13 = scmp.lt.s32.totalorder %s632_s8, %s632_s8 }
 0x19d   :  { %p639_p0 = por %p638_p13, %p637_p12 }
 0x19e   :  { %247 = vbcast.lane.b32.xlu1 %v244_v43, 272  ;;  %278 = vbcast.lane.b32.xlu0 %v232_v41, 256 }
 0x19f   :  { %p640_p1 = pnand %p639_p0, %p633_p11 }
 0x1a2   :  { %251 = vbcast.lane.b32.xlu1 %v244_v43, 280  ;;  %285 = vbcast.lane.b32.xlu0 %v244_v43, 256 }
 0x1a6   :  { %282 = vbcast.lane.b32.xlu1 %v232_v41, 264 }
 0x1aa   :  { %289 = vbcast.lane.b32.xlu1 %v244_v43, 264 }
 0x20c   :  { %v240_v46 = vpop.permute.xlu1 %239  ;;  %v236_v47 = vpop.permute.xlu0 %235 }
 0x20d   :  { %v261_v48 = vmul.f32 %v253_v44, %v236_v47  ;;  %v262_v49 = vmul.f32 %v254_v45, %v236_v47  ;;  %v263_v62 = vmul.f32 %v255_v52, %v240_v46  ;;  %v264_v63 = vmul.f32 %v256_v53, %v240_v46 }
 0x20f   :  { %v269_v54 = vmax.f32 %v261_v48, 0.0  ;;  %v270_v55 = vmax.f32 %v262_v49, 0.0  ;;  %v271_v10 = vmax.f32 %v263_v62, 0.0  ;;  %v272_v11 = vmax.f32 %v264_v63, 0.0 }
 0x210   :  { %v248_v56 = vpop.permute.xlu1 %247  ;;  %v279_v57 = vpop.permute.xlu0 %278 }
 0x211   :  { %v265_v58 = vmul.f32 %v257_v50, %v248_v56  ;;  %v266_v59 = vmul.f32 %v258_v51, %v248_v56  ;;  %v291_v60 = vadd.f32 %v279_v57, %v269_v54  ;;  %v292_v61 = vadd.f32 %v279_v57, %v270_v55  ;;  %v447_v54 = vld [vmem:[#allocation7 + $0x10] sm:$0xff]  ;;  %v448_v55 = vld [vmem:[#allocation7 + $0x18] sm:$0xff]  ;;  %v445_v56 = vld [vmem:[#allocation7] sm:$0xff] }
 0x212   :  { %v446_v57 = vld [vmem:[#allocation7 + $0x8] sm:$0xff] }
 0x213   :  { %v273_v0 = vmax.f32 %v265_v58, 0.0  ;;  %v274_v1 = vmax.f32 %v266_v59, 0.0  ;;  %v299_v2 = vmax.f32 %v291_v60, 0.0  ;;  %v300_v3 = vmax.f32 %v292_v61, 0.0 }
 0x214   :  { %v252_v6 = vpop.permute.xlu1 %251  ;;  %v286_v7 = vpop.permute.xlu0 %285 }
 0x215   :  { %v295_v8 = vadd.f32 %v286_v7, %v273_v0  ;;  %v296_v9 = vadd.f32 %v286_v7, %v274_v1  ;;  %v307_v13 = vmin.f32 %v299_v2, %v300_v3  ;;  %v267_v14 = vmul.f32 %v259_v4, %v252_v6  ;;  %v449_v0 = vld [vmem:[#allocation7 + $0x20] sm:$0xff]  ;;  %v450_v1 = vld [vmem:[#allocation7 + $0x28] sm:$0xff]  ;;  %v452_v7 = vld [vmem:[#allocation7 + $0x38] sm:$0xff] }
 0x216   :  { %v268_v15 = vmul.f32 %v260_v5, %v252_v6  ;;  %v451_v6 = vld [vmem:[#allocation7 + $0x30] sm:$0xff] }
 0x217   :  { %v303_v16 = vmax.f32 %v295_v8, 0.0  ;;  %v304_v18 = vmax.f32 %v296_v9, 0.0  ;;  %308 = vmin.xlane.f32.xlu0 %v307_v13  ;;  %v275_v25 = vmax.f32 %v267_v14, 0.0 }
 0x218   :  { %v283_v19 = vpop.permute.xlu1 %282  ;;  %v276_v26 = vmax.f32 %v268_v15, 0.0 }
 0x219   :  { %v293_v20 = vadd.f32 %v283_v19, %v271_v10  ;;  %v294_v22 = vadd.f32 %v283_v19, %v272_v11  ;;  %v313_v24 = vmin.f32 %v303_v16, %v304_v18 }
 0x21b   :  { %v301_v27 = vmax.f32 %v293_v20, 0.0  ;;  %v302_v28 = vmax.f32 %v294_v22, 0.0  ;;  %314 = vmin.xlane.f32.xlu0 %v313_v24 }
 0x21c   :  { %v290_v29 = vpop.permute.xlu1 %289 }
 0x21d   :  { %v297_v30 = vadd.f32 %v290_v29, %v275_v25  ;;  %v298_v31 = vadd.f32 %v290_v29, %v276_v26  ;;  %v310_v32 = vmin.f32 %v301_v27, %v302_v28 }
 0x21f   :  { %v305_v33 = vmax.f32 %v297_v30, 0.0  ;;  %v306_v34 = vmax.f32 %v298_v31, 0.0  ;;  %311 = vmin.xlane.f32.xlu1 %v310_v32 }
 0x221   :  { %v316_v35 = vmin.f32 %v305_v33, %v306_v34 }
 0x223   :  { %317 = vmin.xlane.f32.xlu0 %v316_v35 }
 0x2a0   :  { %v309_v39 = vpop.xlane.xlu0 %308 }
 0x2a1   :  { %v335_v45 = vrot.slane %v309_v39, %v750_v21 }
 0x2a4   :  { %v315_v40 = vpop.xlane.xlu0 %314 }
 0x2a5   :  { %v344_v46 = vrot.slane %v315_v40, %v750_v21 }
 0x2a8   :  { %v312_v41 = vpop.xlane.xlu1 %311 }
 0x2a9   :  { %v339_v43 = vrot.slane %v312_v41, %v753_v23 }
 0x2ab   :  { %v340_v48 = vsel %vm143_vm1, %v339_v43, %v335_v45 }
 0x2ac   :  { %v318_v44 = vpop.xlane.xlu0 %317 }
 0x2ad   :  { %v348_v47 = vrot.slane %v318_v44, %v753_v23 }
 0x2af   :  { %v349_v49 = vsel %vm143_vm1, %v348_v47, %v344_v46 }
 0x2b0   :  { %v350_v50 = vsel %vm154_vm2, %v349_v49, %v340_v48 }
 0x2b1   :  { %518 = vmatmul.mubr.msk.f32.vlgmr.msra.gmra.mxu1 %vm156_vm3, %v350_v50 }
 0x371   :  { %v419_v51 = vpop.f32.mrf.mxu1 }
 0x372   :  { %v420_v52 = vadd.f32 %v498_v12, %v419_v51 }
 0x373   :  { %v519_v53 = vpop.f32.mrf.mxu1 }
 0x374   :  { %v426_v21 = vrot.slane %v420_v52, %v231_v37  ;;  %v437_v23 = vrot.slane %v420_v52, %v243_v42 }
 0x376   :  { %432 = vbcast.lane.b32.xlu1 %v426_v21, 264  ;;  %428 = vbcast.lane.b32.xlu0 %v426_v21, 256 }
 0x37a   :  { %439 = vbcast.lane.b32.xlu1 %v437_v23, 256 }
 0x37e   :  { %443 = vbcast.lane.b32.xlu1 %v437_v23, 264 }
 0x3e8   :  { %v433_v58 = vpop.permute.xlu1 %432  ;;  %v429_v59 = vpop.permute.xlu0 %428 }
 0x3e9   :  { %v455_v60 = vadd.f32 %v447_v54, %v433_v58  ;;  %v456_v61 = vadd.f32 %v448_v55, %v433_v58  ;;  %v453_v62 = vadd.f32 %v445_v56, %v429_v59  ;;  %v454_v63 = vadd.f32 %v446_v57, %v429_v59 }
 0x3eb   :  { %v463_v37 = vmin.f32 %v455_v60, 0.0  ;;  %v464_v2 = vmin.f32 %v456_v61, 0.0  ;;  %v461_v3 = vmin.f32 %v453_v62, 0.0  ;;  %v462_v4 = vmin.f32 %v454_v63, 0.0 }
 0x3ec   :  { %v440_v17 = vpop.permute.xlu1 %439 }
 0x3ed   :  { %471 = vst [vmem:[#allocation11 + $0x10] sm:$0xff] %v463_v37  ;;  %472 = vst [vmem:[#allocation11 + $0x18] sm:$0xff] %v464_v2  ;;  %v457_v42 = vadd.f32 %v449_v0, %v440_v17  ;;  %v458_v5 = vadd.f32 %v450_v1, %v440_v17 }
 0x3ee   :  { %469 = vst [vmem:[#allocation11] sm:$0xff] %v461_v3  ;;  %470 = vst [vmem:[#allocation11 + $0x8] sm:$0xff] %v462_v4 }
 0x3ef   :  { %v465_v8 = vmin.f32 %v457_v42, 0.0  ;;  %v466_v9 = vmin.f32 %v458_v5, 0.0 }
 0x3f0   :  { %v444_v10 = vpop.permute.xlu1 %443 }
 0x3f1   :  { %473 = vst [vmem:[#allocation11 + $0x20] sm:$0xff] %v465_v8  ;;  %474 = vst [vmem:[#allocation11 + $0x28] sm:$0xff] %v466_v9  ;;  %v459_v11 = vadd.f32 %v451_v6, %v444_v10  ;;  %v460_v13 = vadd.f32 %v452_v7, %v444_v10 }
 0x3f3   :  { %v467_v14 = vmin.f32 %v459_v11, 0.0  ;;  %v468_v15 = vmin.f32 %v460_v13, 0.0 }
 0x3f5   :  { %475 = vst [vmem:[#allocation11 + $0x30] sm:$0xff] %v467_v14  ;;  %476 = vst [vmem:[#allocation11 + $0x38] sm:$0xff] %v468_v15 }
 0x3f6   :  { %643 = shalt.err (!%p640_p1)
}
 0x3f7   :  { %488 = dma.vmem_to_hbm [thread:$0]  %s483_s28, 1024, %s801_s7, [#allocation4], %s662_s29, %s662_s29, %s663_s30  }
 0x3f8   :  { %658 = dma.done.wait [#allocation4], 1024  }
 0x3f9   :  { %659 = vsyncadd [#allocation4], 4294966272 }
 0x3fa   :  { %492 = vsyncpa [#allocation3], 1 }
 0x3fb   :  { %493 = vsyncpa [#allocation6], 1 }
 0x3fc   :  { %494 = vsyncpa [#allocation9], 1 }
 0x3fd   :  { %495 = vsyncpa [#allocation4], 1 }

</bundles_post_ra>
